<compile_context>
chip_gen: v5e
topology: v5e:2x2
jax: 0.10.0
libtpu: 0.0.40
codegen_flags: <defaults>
</compile_context>

<pallas_src>
import functools

import jax
import jax.numpy as jnp
from jax.experimental import pallas as pl
from jax.experimental.pallas import tpu as pltpu


# -----------------------------------------------------------------------------
# Pallas kernel: full GCLSTM sequence.  Grid = (batch_blocks, time_blocks).
# -----------------------------------------------------------------------------
def _gclstm_seq_kernel(x_ref, ahat_ref, dinv_ref, h0_ref, c0_ref,
                       wx_ref, wh_ref, b_ref, h_ref, c_ref,
                       *, t_block, matmul_dtype):
    tb = pl.program_id(1)

    # h_ref / c_ref double as the VMEM-resident recurrent state: their block
    # index is constant along the (trailing, "arbitrary") time axis, so they
    # only hit HBM after the last time block of each batch block.
    @pl.when(tb == 0)
    def _init():
        h_ref[...] = h0_ref[...]
        c_ref[...] = c0_ref[...]

    h = h_ref[...]            # (bb, N, H)  f32 recurrent state
    c = c_ref[...]            # (bb, N, H)  f32
    bb, n, hdim = h.shape

    # Static unroll over the T_blk timesteps resident in VMEM.
    for tl in range(t_block):
        x = x_ref[:, tl]      # (bb, N, D)   matmul_dtype
        ahat = ahat_ref[:, tl]  # (bb, N, N)  matmul_dtype (diag already 1)
        dinv = dinv_ref[:, tl]  # (bb, N, 1)  f32
        wx = wx_ref[tl]       # (D, 4H)      matmul_dtype
        wh = wh_ref[tl]       # (H, 4H)      matmul_dtype
        b = b_ref[tl]         # (1, 4H)      f32

        d = x.shape[-1]

        # Fused 4H-wide gate pre-activation: two MXU passes (no lane concat).
        z = (jnp.dot(x.reshape(bb * n, d), wx,
                     preferred_element_type=jnp.float32)
             + jnp.dot(h.reshape(bb * n, hdim).astype(matmul_dtype), wh,
                       preferred_element_type=jnp.float32))
        z = z.reshape(bb, n, 4 * hdim)

        # GCN normalization without materializing A_norm:
        #   A_norm @ z = dinv * (A_hat @ (dinv * z))
        agg = jnp.einsum("bij,bjk->bik", ahat,
                         (dinv * z).astype(matmul_dtype),
                         preferred_element_type=jnp.float32)   # (bb, N, 4H)
        agg = dinv * agg + b

        # Full-width (128-lane) nonlinearities, then H-wide slices.
        sg = jax.nn.sigmoid(agg)
        th = jnp.tanh(agg)
        i_g = sg[..., 0 * hdim:1 * hdim]
        f_g = sg[..., 1 * hdim:2 * hdim]
        g_g = th[..., 2 * hdim:3 * hdim]
        o_g = sg[..., 3 * hdim:4 * hdim]

        c = f_g * c + i_g * g_g
        h = o_g * jnp.tanh(c)

    h_ref[...] = h.astype(h_ref.dtype)
    c_ref[...] = c.astype(c_ref.dtype)


def gclstm_forward(x, adj, h0, c0, wx_all, wh_all, b_all, *,
                   batch_block=None, t_block=None,
                   matmul_dtype=jnp.bfloat16):
    """Full GCLSTM forward (all timesteps) in a single pallas_call.

    batch_block: grid-parallel batch tile (bb).  Default = B (best for
      single-TC v5e/v6e); pass B//2 or smaller on v7x so both TensorCores
      get work.
    t_block: timesteps resident per grid step (amortizes grid-step overhead).
    matmul_dtype: streamed dtype of x/adj/W and MXU input dtype (bf16 default,
      f32 for an exact-semantics path).
    """
    B, S, N, D = x.shape
    H = h0.shape[-1]
    bb = B if batch_block is None else batch_block
    assert B % bb == 0, "batch_block must divide batch"
    if t_block is None:
        t_block = next(t for t in range(min(S, 8), 0, -1) if S % t == 0)
    assert S % t_block == 0, "t_block must divide sequence length"

    # --- GCN normalization hoisted out of the kernel (fuses with the cast) ---
    eye = jnp.eye(N, dtype=jnp.bool_)
    adj_hat_f32 = jnp.where(eye, jnp.float32(1.0), adj)          # (B,S,N,N)
    deg = jnp.maximum(jnp.sum(adj_hat_f32, axis=-1, keepdims=True), 1.0)
    dinv = jax.lax.rsqrt(deg)                                    # (B,S,N,1) f32

    # --- Stream the big MXU operands in matmul_dtype straight from HBM ------
    adj_hat = adj_hat_f32.astype(matmul_dtype)
    x_s = x.astype(matmul_dtype)
    wx_s = wx_all.astype(matmul_dtype)
    wh_s = wh_all.astype(matmul_dtype)

    kernel = functools.partial(_gclstm_seq_kernel, t_block=t_block,
                               matmul_dtype=matmul_dtype)

    grid = (B // bb, S // t_block)   # (parallel batch blocks, sequential time)
    grid_spec = pltpu.PrefetchScalarGridSpec(
        num_scalar_prefetch=0,
        grid=grid,
        in_specs=[
            # Original (B,S,N,*) layout indexed directly: no wrapper transposes.
            pl.BlockSpec((bb, t_block, N, D), lambda bi, tb: (bi, tb, 0, 0)),  # x
            pl.BlockSpec((bb, t_block, N, N), lambda bi, tb: (bi, tb, 0, 0)),  # A_hat
            pl.BlockSpec((bb, t_block, N, 1), lambda bi, tb: (bi, tb, 0, 0)),  # dinv
            pl.BlockSpec((bb, N, H), lambda bi, tb: (bi, 0, 0)),               # h0
            pl.BlockSpec((bb, N, H), lambda bi, tb: (bi, 0, 0)),               # c0
            pl.BlockSpec((t_block, D, 4 * H), lambda bi, tb: (tb, 0, 0)),      # Wx
            pl.BlockSpec((t_block, H, 4 * H), lambda bi, tb: (tb, 0, 0)),      # Wh
            pl.BlockSpec((t_block, 1, 4 * H), lambda bi, tb: (tb, 0, 0)),      # b
        ],
        out_specs=[
            pl.BlockSpec((bb, N, H), lambda bi, tb: (bi, 0, 0)),               # h
            pl.BlockSpec((bb, N, H), lambda bi, tb: (bi, 0, 0)),               # c
        ],
    )

    itemsize = jnp.dtype(matmul_dtype).itemsize
    flops = 2 * B * S * N * 4 * H * ((D + H) + N)           # gate + aggregation
    transcendentals = 9 * B * S * N * H                     # 4H sigmoid + 4H tanh + H tanh
    bytes_accessed = (itemsize * (x.size + adj.size + wx_all.size + wh_all.size)
                      + 4 * (dinv.size + b_all.size + 2 * h0.size + 2 * c0.size))

    return pl.pallas_call(
        kernel,
        out_shape=(jax.ShapeDtypeStruct((B, N, H), jnp.float32),
                   jax.ShapeDtypeStruct((B, N, H), jnp.float32)),
        grid_spec=grid_spec,
        compiler_params=pltpu.CompilerParams(
            dimension_semantics=("parallel", "arbitrary"),
            # Explicit budget above the 16/32 MiB scoped defaults, still safe
            # under v7x's 64 MiB physical VMEM.  Size bb/t_block so
            # 2*bb*t_block*N^2*itemsize (adj double-buffer) fits comfortably.
            vmem_limit_bytes=48 * 1024 * 1024),
        cost_estimate=pl.CostEstimate(flops=int(flops),
                                      transcendentals=int(transcendentals),
                                      bytes_accessed=int(bytes_accessed)),
    )(x_s, adj_hat, dinv, h0, c0, wx_s, wh_s, b_all)


# -----------------------------------------------------------------------------
# Pure-JAX reference (mirrors the PyTorch / PyG semantics) for validation.
# -----------------------------------------------------------------------------
def _dense_gcn_ref(x, adj, w, b):
    N = adj.shape[-1]
    eye = jnp.eye(N, dtype=jnp.bool_)
    adj_hat = jnp.where(eye[None], 1.0, adj)
    deg = jnp.maximum(jnp.sum(adj_hat, axis=-1), 1.0)
    dinv = deg ** -0.5
    norm = dinv[:, :, None] * adj_hat * dinv[:, None, :]
    return jnp.einsum("bij,bjk->bik", norm, jnp.einsum("bnd,dk->bnk", x, w)) + b


def gclstm_forward_ref(x, adj, h0, c0, wx_all, wh_all, b_all):
    h, c = h0, c0
    S = x.shape[1]
    H = h0.shape[-1]
    for t in range(S):
        wx, wh, b = wx_all[t], wh_all[t], b_all[t]
        pre = (_dense_gcn_ref(x[:, t], adj[:, t], wx, b) +
               _dense_gcn_ref(h, adj[:, t], wh, jnp.zeros_like(b)))
        i_g = jax.nn.sigmoid(pre[..., 0 * H:1 * H])
        f_g = jax.nn.sigmoid(pre[..., 1 * H:2 * H])
        g_g = jnp.tanh(pre[..., 2 * H:3 * H])
        o_g = jax.nn.sigmoid(pre[..., 3 * H:4 * H])
        c = f_g * c + i_g * g_g
        h = o_g * jnp.tanh(c)
    return h, c


# -----------------------------------------------------------------------------
if __name__ == "__main__":
    B, S, N, D, H = 2, 8, 16, 8, 32   # batch, seq, nodes, input dim, hidden dim
    key = jax.random.PRNGKey(0)
    kx, kadj, kh, kc, kw = jax.random.split(key, 5)

    x = jax.random.normal(kx, (B, S, N, D), dtype=jnp.float32)
    adj = (jax.random.uniform(kadj, (B, S, N, N)) > 0.7).astype(jnp.float32)
    adj = jnp.maximum(adj, jnp.swapaxes(adj, -1, -2))   # symmetric 0/1 adjacency
    h0 = jax.random.normal(kh, (B, N, H), dtype=jnp.float32)
    c0 = jax.random.normal(kc, (B, N, H), dtype=jnp.float32)

    # Deterministic per-timestep weights, gate order [i, f, g, o] along 4H.
    # Each gate packs the x-GCN (D->H) and h-GCN (H->H); the bias is the sum
    # of the two GCN biases (exact algebraic equivalence, see header).
    wx_l, wh_l, b_l = [], [], []
    for t in range(S):
        kt = jax.random.fold_in(kw, t)
        k1, k2, k3 = jax.random.split(kt, 3)
        wx_l.append(jax.random.normal(k1, (D, 4 * H), jnp.float32) * (1.0 / D ** 0.5))
        wh_l.append(jax.random.normal(k2, (H, 4 * H), jnp.float32) * (1.0 / H ** 0.5))
        b_l.append(jax.random.normal(k3, (1, 4 * H), jnp.float32) * 0.1)
    wx_all = jnp.stack(wx_l)     # (S, D, 4H)
    wh_all = jnp.stack(wh_l)     # (S, H, 4H)
    b_all = jnp.stack(b_l)       # (S, 1, 4H)

    h_ref, c_ref = gclstm_forward_ref(x, adj, h0, c0, wx_all, wh_all, b_all)

    # Exact-semantics path (f32 streams + f32 MXU inputs) -> tight tolerance.
    # batch_block=1 / t_block=2 also exercises both grid axes (carry across
    # time blocks, parallel batch blocks).
    h32, c32 = gclstm_forward(x, adj, h0, c0, wx_all, wh_all, b_all,
                              batch_block=1, t_block=2,
                              matmul_dtype=jnp.float32)
    jax.block_until_ready((h32, c32))
    assert jnp.allclose(h32, h_ref, atol=1e-4, rtol=1e-4), "hidden mismatch (f32)"
    assert jnp.allclose(c32, c_ref, atol=1e-4, rtol=1e-4), "cell mismatch (f32)"

    # Performance path: bf16 streams + bf16 MXU inputs, f32 accumulation and
    # f32 gate/state math.  NOTE: bf16 error compounds over S; validate at the
    # production sequence length before deploying.
    hbf, cbf = gclstm_forward(x, adj, h0, c0, wx_all, wh_all, b_all,
                              t_block=4, matmul_dtype=jnp.bfloat16)
    jax.block_until_ready((hbf, cbf))
    assert jnp.allclose(hbf, h_ref, atol=1e-1, rtol=1e-1), "hidden mismatch (bf16)"
    assert jnp.allclose(cbf, c_ref, atol=1e-1, rtol=1e-1), "cell mismatch (bf16)"

    print("KERNEL_OK")
</pallas_src>

<mosaic_0001>
module attributes {stable_mosaic.version = 11 : i64} {
  func.func @_gclstm_seq_kernel(%arg0: i32, %arg1: i32, %arg2: memref<1x2x16x8xf32, #tpu.memory_space<vmem>>, %arg3: memref<1x2x16x16xf32, #tpu.memory_space<vmem>>, %arg4: memref<1x2x16x1xf32, #tpu.memory_space<vmem>>, %arg5: memref<1x16x32xf32, #tpu.memory_space<vmem>>, %arg6: memref<1x16x32xf32, #tpu.memory_space<vmem>>, %arg7: memref<2x8x128xf32, #tpu.memory_space<vmem>>, %arg8: memref<2x32x128xf32, #tpu.memory_space<vmem>>, %arg9: memref<2x1x128xf32, #tpu.memory_space<vmem>>, %arg10: memref<1x16x32xf32, #tpu.memory_space<vmem>>, %arg11: memref<1x16x32xf32, #tpu.memory_space<vmem>>) attributes {dimension_semantics = [#tpu.dimension_semantics<parallel>, #tpu.dimension_semantics<arbitrary>], iteration_bounds = array<i64: 2, 4>, scalar_prefetch = 0 : i64, scratch_operands = 0 : i64, tpu.core_type = #tpu.core_type<tc>, window_params = [{transform_indices = @transform_0, window_bounds = array<i64: 1, 2, 16, 8>}, {transform_indices = @transform_1, window_bounds = array<i64: 1, 2, 16, 16>}, {transform_indices = @transform_2, window_bounds = array<i64: 1, 2, 16, 1>}, {transform_indices = @transform_3, window_bounds = array<i64: 1, 16, 32>}, {transform_indices = @transform_4, window_bounds = array<i64: 1, 16, 32>}, {transform_indices = @transform_5, window_bounds = array<i64: 2, 8, 128>}, {transform_indices = @transform_6, window_bounds = array<i64: 2, 32, 128>}, {transform_indices = @transform_7, window_bounds = array<i64: 2, 1, 128>}, {transform_indices = @transform_8, window_bounds = array<i64: 1, 16, 32>}, {transform_indices = @transform_9, window_bounds = array<i64: 1, 16, 32>}]} {
    %c0_i32 = arith.constant 0 : i32
    %0 = arith.cmpi eq, %arg1, %c0_i32 : i32
    %1 = arith.extui %0 : i1 to i32
    %c0_i32_0 = arith.constant 0 : i32
    %2 = arith.cmpi ne, %1, %c0_i32_0 : i32
    scf.if %2 {
      %c0_60 = arith.constant 0 : index
      %c0_61 = arith.constant 0 : index
      %c0_62 = arith.constant 0 : index
      %89 = vector.load %arg5[%c0_60, %c0_61, %c0_62] : memref<1x16x32xf32, #tpu.memory_space<vmem>>, vector<1x16x32xf32>
      %c0_63 = arith.constant 0 : index
      %c0_64 = arith.constant 0 : index
      %c0_65 = arith.constant 0 : index
      %90 = vector.load %arg10[%c0_63, %c0_64, %c0_65] : memref<1x16x32xf32, #tpu.memory_space<vmem>>, vector<1x16x32xf32>
      tpu.vector_store %arg10[%c0_63, %c0_64, %c0_65], %89 {strides = array<i32>} : memref<1x16x32xf32, #tpu.memory_space<vmem>>, vector<1x16x32xf32>,
      %c0_66 = arith.constant 0 : index
      %c0_67 = arith.constant 0 : index
      %c0_68 = arith.constant 0 : index
      %91 = vector.load %arg6[%c0_66, %c0_67, %c0_68] : memref<1x16x32xf32, #tpu.memory_space<vmem>>, vector<1x16x32xf32>
      %c0_69 = arith.constant 0 : index
      %c0_70 = arith.constant 0 : index
      %c0_71 = arith.constant 0 : index
      %92 = vector.load %arg11[%c0_69, %c0_70, %c0_71] : memref<1x16x32xf32, #tpu.memory_space<vmem>>, vector<1x16x32xf32>
      tpu.vector_store %arg11[%c0_69, %c0_70, %c0_71], %91 {strides = array<i32>} : memref<1x16x32xf32, #tpu.memory_space<vmem>>, vector<1x16x32xf32>,
    } else {
    }
    %c0 = arith.constant 0 : index
    %c0_1 = arith.constant 0 : index
    %c0_2 = arith.constant 0 : index
    %3 = vector.load %arg10[%c0, %c0_1, %c0_2] : memref<1x16x32xf32, #tpu.memory_space<vmem>>, vector<1x16x32xf32>
    %c0_3 = arith.constant 0 : index
    %c0_4 = arith.constant 0 : index
    %c0_5 = arith.constant 0 : index
    %4 = vector.load %arg11[%c0_3, %c0_4, %c0_5] : memref<1x16x32xf32, #tpu.memory_space<vmem>>, vector<1x16x32xf32>
    %c0_6 = arith.constant 0 : index
    %c0_7 = arith.constant 0 : index
    %c0_8 = arith.constant 0 : index
    %c0_9 = arith.constant 0 : index
    %5 = vector.load %arg2[%c0_6, %c0_7, %c0_8, %c0_9] : memref<1x2x16x8xf32, #tpu.memory_space<vmem>>, vector<1x1x16x8xf32>
    %6 = vector.shape_cast %5 : vector<1x1x16x8xf32> to vector<1x16x8xf32>
    %c0_10 = arith.constant 0 : index
    %c0_11 = arith.constant 0 : index
    %c0_12 = arith.constant 0 : index
    %c0_13 = arith.constant 0 : index
    %7 = vector.load %arg3[%c0_10, %c0_11, %c0_12, %c0_13] : memref<1x2x16x16xf32, #tpu.memory_space<vmem>>, vector<1x1x16x16xf32>
    %8 = vector.shape_cast %7 : vector<1x1x16x16xf32> to vector<1x16x16xf32>
    %c0_14 = arith.constant 0 : index
    %c0_15 = arith.constant 0 : index
    %c0_16 = arith.constant 0 : index
    %c0_17 = arith.constant 0 : index
    %9 = vector.load %arg4[%c0_14, %c0_15, %c0_16, %c0_17] : memref<1x2x16x1xf32, #tpu.memory_space<vmem>>, vector<1x1x16x1xf32>
    %10 = vector.shape_cast %9 : vector<1x1x16x1xf32> to vector<1x16x1xf32>
    %c0_18 = arith.constant 0 : index
    %c0_19 = arith.constant 0 : index
    %c0_20 = arith.constant 0 : index
    %11 = vector.load %arg7[%c0_18, %c0_19, %c0_20] : memref<2x8x128xf32, #tpu.memory_space<vmem>>, vector<1x8x128xf32>
    %12 = vector.shape_cast %11 : vector<1x8x128xf32> to vector<8x128xf32>
    %c0_21 = arith.constant 0 : index
    %c0_22 = arith.constant 0 : index
    %c0_23 = arith.constant 0 : index
    %13 = vector.load %arg8[%c0_21, %c0_22, %c0_23] : memref<2x32x128xf32, #tpu.memory_space<vmem>>, vector<1x32x128xf32>
    %14 = vector.shape_cast %13 : vector<1x32x128xf32> to vector<32x128xf32>
    %c0_24 = arith.constant 0 : index
    %c0_25 = arith.constant 0 : index
    %c0_26 = arith.constant 0 : index
    %15 = vector.load %arg9[%c0_24, %c0_25, %c0_26] : memref<2x1x128xf32, #tpu.memory_space<vmem>>, vector<1x1x128xf32>
    %16 = vector.shape_cast %15 : vector<1x1x128xf32> to vector<1x128xf32>
    %17 = vector.shape_cast %6 : vector<1x16x8xf32> to vector<16x8xf32>
    %cst = arith.constant dense<0.000000e+00> : vector<16x128xf32>
    %18 = tpu.matmul %17, %12, %cst {dimension_numbers = #tpu.dot_dimension_numbers<[1], [0], [0], [1], [0, 0, 1, 1], [], []>} : vector<16x8xf32>, vector<8x128xf32>, vector<16x128xf32> -> vector<16x128xf32>
    %19 = vector.shape_cast %3 : vector<1x16x32xf32> to vector<16x32xf32>
    %cst_27 = arith.constant dense<0.000000e+00> : vector<16x128xf32>
    %20 = tpu.matmul %19, %14, %cst_27 {dimension_numbers = #tpu.dot_dimension_numbers<[1], [0], [0], [1], [0, 0, 1, 1], [], []>} : vector<16x32xf32>, vector<32x128xf32>, vector<16x128xf32> -> vector<16x128xf32>
    %21 = arith.addf %18, %20 : vector<16x128xf32>
    %22 = vector.shape_cast %21 : vector<16x128xf32> to vector<1x16x128xf32>
    %23 = vector.broadcast %10 : vector<1x16x1xf32> to vector<1x16x128xf32>
    %24 = arith.mulf %23, %22 : vector<1x16x128xf32>
    "tpu.trace_start"() <{level = 10 : i32, message = "bij,bjk->bik"}> : () -> ()
    %cst_28 = arith.constant dense<0.000000e+00> : vector<1x16x128xf32>
    %25 = tpu.matmul %8, %24, %cst_28 {dimension_numbers = #tpu.dot_dimension_numbers<[2], [1], [1], [2], [0, 0, 0, 1, 1, 2], [0], [0]>} : vector<1x16x16xf32>, vector<1x16x128xf32>, vector<1x16x128xf32> -> vector<1x16x128xf32>
    "tpu.trace_stop"() : () -> ()
    %26 = vector.broadcast %10 : vector<1x16x1xf32> to vector<1x16x128xf32>
    %27 = arith.mulf %26, %25 : vector<1x16x128xf32>
    %28 = vector.shape_cast %16 : vector<1x128xf32> to vector<1x1x128xf32>
    %29 = vector.broadcast %28 : vector<1x1x128xf32> to vector<1x16x128xf32>
    %30 = arith.addf %27, %29 : vector<1x16x128xf32>
    %31 = arith.negf %30 : vector<1x16x128xf32>
    %32 = math.exp %31 : vector<1x16x128xf32>
    %cst_29 = arith.constant 1.000000e+00 : f32
    %33 = vector.broadcast %cst_29 : f32 to vector<1x16x128xf32>
    %34 = arith.addf %33, %32 : vector<1x16x128xf32>
    %35 = arith.divf %33, %34 : vector<1x16x128xf32>
    %36 = math.tanh %30 : vector<1x16x128xf32>
    %37 = vector.extract_strided_slice %35 {offsets = [0, 0, 0], sizes = [1, 16, 32], strides = [1, 1, 1]} : vector<1x16x128xf32> to vector<1x16x32xf32>
    %38 = vector.extract_strided_slice %35 {offsets = [0, 0, 32], sizes = [1, 16, 32], strides = [1, 1, 1]} : vector<1x16x128xf32> to vector<1x16x32xf32>
    %39 = vector.extract_strided_slice %36 {offsets = [0, 0, 64], sizes = [1, 16, 32], strides = [1, 1, 1]} : vector<1x16x128xf32> to vector<1x16x32xf32>
    %40 = vector.extract_strided_slice %35 {offsets = [0, 0, 96], sizes = [1, 16, 32], strides = [1, 1, 1]} : vector<1x16x128xf32> to vector<1x16x32xf32>
    %41 = arith.mulf %38, %4 : vector<1x16x32xf32>
    %42 = arith.mulf %37, %39 : vector<1x16x32xf32>
    %43 = arith.addf %41, %42 : vector<1x16x32xf32>
    %44 = math.tanh %43 : vector<1x16x32xf32>
    %45 = arith.mulf %40, %44 : vector<1x16x32xf32>
    %c0_30 = arith.constant 0 : index
    %c1 = arith.constant 1 : index
    %c0_31 = arith.constant 0 : index
    %c0_32 = arith.constant 0 : index
    %46 = vector.load %arg2[%c0_30, %c1, %c0_31, %c0_32] : memref<1x2x16x8xf32, #tpu.memory_space<vmem>>, vector<1x1x16x8xf32>
    %47 = vector.shape_cast %46 : vector<1x1x16x8xf32> to vector<1x16x8xf32>
    %c0_33 = arith.constant 0 : index
    %c1_34 = arith.constant 1 : index
    %c0_35 = arith.constant 0 : index
    %c0_36 = arith.constant 0 : index
    %48 = vector.load %arg3[%c0_33, %c1_34, %c0_35, %c0_36] : memref<1x2x16x16xf32, #tpu.memory_space<vmem>>, vector<1x1x16x16xf32>
    %49 = vector.shape_cast %48 : vector<1x1x16x16xf32> to vector<1x16x16xf32>
    %c0_37 = arith.constant 0 : index
    %c1_38 = arith.constant 1 : index
    %c0_39 = arith.constant 0 : index
    %c0_40 = arith.constant 0 : index
    %50 = vector.load %arg4[%c0_37, %c1_38, %c0_39, %c0_40] : memref<1x2x16x1xf32, #tpu.memory_space<vmem>>, vector<1x1x16x1xf32>
    %51 = vector.shape_cast %50 : vector<1x1x16x1xf32> to vector<1x16x1xf32>
    %c1_41 = arith.constant 1 : index
    %c0_42 = arith.constant 0 : index
    %c0_43 = arith.constant 0 : index
    %52 = vector.load %arg7[%c1_41, %c0_42, %c0_43] : memref<2x8x128xf32, #tpu.memory_space<vmem>>, vector<1x8x128xf32>
    %53 = vector.shape_cast %52 : vector<1x8x128xf32> to vector<8x128xf32>
    %c1_44 = arith.constant 1 : index
    %c0_45 = arith.constant 0 : index
    %c0_46 = arith.constant 0 : index
    %54 = vector.load %arg8[%c1_44, %c0_45, %c0_46] : memref<2x32x128xf32, #tpu.memory_space<vmem>>, vector<1x32x128xf32>
    %55 = vector.shape_cast %54 : vector<1x32x128xf32> to vector<32x128xf32>
    %c1_47 = arith.constant 1 : index
    %c0_48 = arith.constant 0 : index
    %c0_49 = arith.constant 0 : index
    %56 = vector.load %arg9[%c1_47, %c0_48, %c0_49] : memref<2x1x128xf32, #tpu.memory_space<vmem>>, vector<1x1x128xf32>
    %57 = vector.shape_cast %56 : vector<1x1x128xf32> to vector<1x128xf32>
    %58 = vector.shape_cast %47 : vector<1x16x8xf32> to vector<16x8xf32>
    %cst_50 = arith.constant dense<0.000000e+00> : vector<16x128xf32>
    %59 = tpu.matmul %58, %53, %cst_50 {dimension_numbers = #tpu.dot_dimension_numbers<[1], [0], [0], [1], [0, 0, 1, 1], [], []>} : vector<16x8xf32>, vector<8x128xf32>, vector<16x128xf32> -> vector<16x128xf32>
    %60 = vector.shape_cast %45 : vector<1x16x32xf32> to vector<16x32xf32>
    %cst_51 = arith.constant dense<0.000000e+00> : vector<16x128xf32>
    %61 = tpu.matmul %60, %55, %cst_51 {dimension_numbers = #tpu.dot_dimension_numbers<[1], [0], [0], [1], [0, 0, 1, 1], [], []>} : vector<16x32xf32>, vector<32x128xf32>, vector<16x128xf32> -> vector<16x128xf32>
    %62 = arith.addf %59, %61 : vector<16x128xf32>
    %63 = vector.shape_cast %62 : vector<16x128xf32> to vector<1x16x128xf32>
    %64 = vector.broadcast %51 : vector<1x16x1xf32> to vector<1x16x128xf32>
    %65 = arith.mulf %64, %63 : vector<1x16x128xf32>
    "tpu.trace_start"() <{level = 10 : i32, message = "bij,bjk->bik"}> : () -> ()
    %cst_52 = arith.constant dense<0.000000e+00> : vector<1x16x128xf32>
    %66 = tpu.matmul %49, %65, %cst_52 {dimension_numbers = #tpu.dot_dimension_numbers<[2], [1], [1], [2], [0, 0, 0, 1, 1, 2], [0], [0]>} : vector<1x16x16xf32>, vector<1x16x128xf32>, vector<1x16x128xf32> -> vector<1x16x128xf32>
    "tpu.trace_stop"() : () -> ()
    %67 = vector.broadcast %51 : vector<1x16x1xf32> to vector<1x16x128xf32>
    %68 = arith.mulf %67, %66 : vector<1x16x128xf32>
    %69 = vector.shape_cast %57 : vector<1x128xf32> to vector<1x1x128xf32>
    %70 = vector.broadcast %69 : vector<1x1x128xf32> to vector<1x16x128xf32>
    %71 = arith.addf %68, %70 : vector<1x16x128xf32>
    %72 = arith.negf %71 : vector<1x16x128xf32>
    %73 = math.exp %72 : vector<1x16x128xf32>
    %cst_53 = arith.constant 1.000000e+00 : f32
    %74 = vector.broadcast %cst_53 : f32 to vector<1x16x128xf32>
    %75 = arith.addf %74, %73 : vector<1x16x128xf32>
    %76 = arith.divf %74, %75 : vector<1x16x128xf32>
    %77 = math.tanh %71 : vector<1x16x128xf32>
    %78 = vector.extract_strided_slice %76 {offsets = [0, 0, 0], sizes = [1, 16, 32], strides = [1, 1, 1]} : vector<1x16x128xf32> to vector<1x16x32xf32>
    %79 = vector.extract_strided_slice %76 {offsets = [0, 0, 32], sizes = [1, 16, 32], strides = [1, 1, 1]} : vector<1x16x128xf32> to vector<1x16x32xf32>
    %80 = vector.extract_strided_slice %77 {offsets = [0, 0, 64], sizes = [1, 16, 32], strides = [1, 1, 1]} : vector<1x16x128xf32> to vector<1x16x32xf32>
    %81 = vector.extract_strided_slice %76 {offsets = [0, 0, 96], sizes = [1, 16, 32], strides = [1, 1, 1]} : vector<1x16x128xf32> to vector<1x16x32xf32>
    %82 = arith.mulf %79, %43 : vector<1x16x32xf32>
    %83 = arith.mulf %78, %80 : vector<1x16x32xf32>
    %84 = arith.addf %82, %83 : vector<1x16x32xf32>
    %85 = math.tanh %84 : vector<1x16x32xf32>
    %86 = arith.mulf %81, %85 : vector<1x16x32xf32>
    %c0_54 = arith.constant 0 : index
    %c0_55 = arith.constant 0 : index
    %c0_56 = arith.constant 0 : index
    %87 = vector.load %arg10[%c0_54, %c0_55, %c0_56] : memref<1x16x32xf32, #tpu.memory_space<vmem>>, vector<1x16x32xf32>
    tpu.vector_store %arg10[%c0_54, %c0_55, %c0_56], %86 {strides = array<i32>} : memref<1x16x32xf32, #tpu.memory_space<vmem>>, vector<1x16x32xf32>,
    %c0_57 = arith.constant 0 : index
    %c0_58 = arith.constant 0 : index
    %c0_59 = arith.constant 0 : index
    %88 = vector.load %arg11[%c0_57, %c0_58, %c0_59] : memref<1x16x32xf32, #tpu.memory_space<vmem>>, vector<1x16x32xf32>
    tpu.vector_store %arg11[%c0_57, %c0_58, %c0_59], %84 {strides = array<i32>} : memref<1x16x32xf32, #tpu.memory_space<vmem>>, vector<1x16x32xf32>,
    return
  }
  func.func @transform_0(%arg0: i32, %arg1: i32) -> (i32, i32, i32, i32) {
    %c0_i32 = arith.constant 0 : i32
    %c0_i32_0 = arith.constant 0 : i32
    %c0_i32_1 = arith.constant 0 : i32
    return %arg0, %arg1, %c0_i32, %c0_i32_0 : i32, i32, i32, i32
  }
  func.func @transform_1(%arg0: i32, %arg1: i32) -> (i32, i32, i32, i32) {
    %c0_i32 = arith.constant 0 : i32
    %c0_i32_0 = arith.constant 0 : i32
    %c0_i32_1 = arith.constant 0 : i32
    return %arg0, %arg1, %c0_i32, %c0_i32_0 : i32, i32, i32, i32
  }
  func.func @transform_2(%arg0: i32, %arg1: i32) -> (i32, i32, i32, i32) {
    %c0_i32 = arith.constant 0 : i32
    %c0_i32_0 = arith.constant 0 : i32
    %c0_i32_1 = arith.constant 0 : i32
    return %arg0, %arg1, %c0_i32, %c0_i32_0 : i32, i32, i32, i32
  }
  func.func @transform_3(%arg0: i32, %arg1: i32) -> (i32, i32, i32) {
    %c0_i32 = arith.constant 0 : i32
    %c0_i32_0 = arith.constant 0 : i32
    %c0_i32_1 = arith.constant 0 : i32
    return %arg0, %c0_i32, %c0_i32_0 : i32, i32, i32
  }
  func.func @transform_4(%arg0: i32, %arg1: i32) -> (i32, i32, i32) {
    %c0_i32 = arith.constant 0 : i32
    %c0_i32_0 = arith.constant 0 : i32
    %c0_i32_1 = arith.constant 0 : i32
    return %arg0, %c0_i32, %c0_i32_0 : i32, i32, i32
  }
  func.func @transform_5(%arg0: i32, %arg1: i32) -> (i32, i32, i32) {
    %c0_i32 = arith.constant 0 : i32
    %c0_i32_0 = arith.constant 0 : i32
    %c0_i32_1 = arith.constant 0 : i32
    return %arg1, %c0_i32, %c0_i32_0 : i32, i32, i32
  }
  func.func @transform_6(%arg0: i32, %arg1: i32) -> (i32, i32, i32) {
    %c0_i32 = arith.constant 0 : i32
    %c0_i32_0 = arith.constant 0 : i32
    %c0_i32_1 = arith.constant 0 : i32
    return %arg1, %c0_i32, %c0_i32_0 : i32, i32, i32
  }
  func.func @transform_7(%arg0: i32, %arg1: i32) -> (i32, i32, i32) {
    %c0_i32 = arith.constant 0 : i32
    %c0_i32_0 = arith.constant 0 : i32
    %c0_i32_1 = arith.constant 0 : i32
    return %arg1, %c0_i32, %c0_i32_0 : i32, i32, i32
  }
  func.func @transform_8(%arg0: i32, %arg1: i32) -> (i32, i32, i32) {
    %c0_i32 = arith.constant 0 : i32
    %c0_i32_0 = arith.constant 0 : i32
    %c0_i32_1 = arith.constant 0 : i32
    return %arg0, %c0_i32, %c0_i32_0 : i32, i32, i32
  }
  func.func @transform_9(%arg0: i32, %arg1: i32) -> (i32, i32, i32) {
    %c0_i32 = arith.constant 0 : i32
    %c0_i32_0 = arith.constant 0 : i32
    %c0_i32_1 = arith.constant 0 : i32
    return %arg0, %c0_i32, %c0_i32_0 : i32, i32, i32
  }
}

</mosaic_0001>

<bundles_post_ra>
// kernel: tpu_custom_call.1
= control target key start
LH: loop header
LB: loop body
LE: loop exit
PB: predicated region body
PF: predicated region fallthrough
CT: control target
= control target key end

     0   :  { %s1885_s0 = inlined_call_operand.vmem [shape: f32[2,8,16,8], index: 0, kind: input, shape index: {}]   ;;  %s1886_s1 = inlined_call_operand.vmem [shape: f32[2,8,16,16], index: 1, kind: input, shape index: {}]   ;;  %s1887_s2 = inlined_call_operand.vmem [shape: f32[2,8,16,1], index: 2, kind: input, shape index: {}]   ;;  %s1888_s3 = inlined_call_operand.vmem [shape: f32[2,16,32], index: 3, kind: input, shape index: {}]   ;;  %s1889_s4 = inlined_call_operand.vmem [shape: f32[2,16,32], index: 4, kind: input, shape index: {}]   ;;  %s1890_s5 = inlined_call_operand.vmem [shape: f32[8,8,128], index: 5, kind: input, shape index: {}]   ;;  %s1891_s6 = inlined_call_operand.vmem [shape: f32[8,32,128], index: 6, kind: input, shape index: {}]   ;;  %s1892_s7 = inlined_call_operand.vmem [shape: f32[8,1,128], index: 7, kind: input, shape index: {}]   ;;  %s1893_s8 = inlined_call_operand.hbm [shape: f32[2,16,32], index: 8, kind: output, shape index: {0}]   ;;  %s1894_s9 = inlined_call_operand.hbm [shape: f32[2,16,32], index: 9, kind: output, shape index: {1}]  }
   0x1   :  { %1908 = sst [smem:[#allocation19_spill]] %s1888_s3 }
   0x2   :  { %1909 = sst [smem:[#allocation20_spill]] %s1893_s8 }
   0x3   :  { %1910 = sst [smem:[#allocation21_spill]] %s1894_s9 }
   0x4   :  { %15 = vsyncpa [#allocation3], 0 }
   0x5   :  { %17 = vsyncpa [#allocation3 + $0x1], 0 }
   0x6   :  { %18 = vsyncpa [#allocation5], 0 }
   0x7   :  { %20 = vsyncpa [#allocation5 + $0x1], 0  ;;  %s1627_s30 = smov 0   ;;  %s1629_s10 = smov 0  }
   0x8   :  { %s1631_s11 = smov 0   ;;  %s1633_s12 = smov 0  }
   0x9   :  { %s1635_s13 = smov 0   ;;  %s1637_s14 = smov 0  }
   0xa   :  { %s1639_s15 = smov 0   ;;  %s1641_s16 = smov 0  }
   0xb LB: > { %1911 = sst [smem:[#allocation8_spill]] %s1541_s30  ;;  %s1251_s17 = sadd.s32 4294967295, %s1569_s16   ;;  %s1569_s16 = sphi %s1641_s16, %s26_s16   ;;  %s1565_s15 = sphi %s1639_s15, %s1938_s15   ;;  %s1561_s14 = sphi %s1637_s14, %s1937_s14   ;;  %s1557_s13 = sphi %s1635_s13, %s1936_s13   ;;  %s1553_s12 = sphi %s1633_s12, %s1935_s12   ;;  %s1549_s11 = sphi %s1631_s11, %s1934_s11   ;;  %s1545_s10 = sphi %s1629_s10, %s1933_s10   ;;  %s1541_s30 = sphi %s1627_s30, %s1932_s30  }
   0xc   : > { %1912 = sst [smem:[#allocation9_spill]] %s1545_s10  ;;  %s1252_s18 = sadd.s32 4294967294, %s1569_s16  }
   0xd   : > { %1913 = sst [smem:[#allocation10_spill]] %s1549_s11  ;;  %s35_s19 = sadd.s32 1, %s1561_s14 }
   0xe   : > { %1914 = sst [smem:[#allocation11_spill]] %s1561_s14  ;;  %p36_p0 = scmp.ge.s32.totalorder %s35_s19, 4 }
   0xf   : > { %1915 = sst [smem:[#allocation12_spill]] %s1565_s15  ;;  %s38_s20 = sadd.s32 1, %s1565_s15 }
  0x10   : > { %1916 = sst [smem:[#allocation13_spill]] %s1569_s16  ;;  %p269_p1 = scmp.ne.s32.totalorder %s1549_s11, %s1545_s10 }
  0x11   : > { %p270_p2 = scmp.eq.s32.totalorder %s1251_s17, 7  ;;  %s1940_s19 = smov (%p36_p0, %s35_s19), 0 }
  0x12   : > { %1917 = sst [smem:[#allocation14_spill]] %s1940_s19  ;;  %s1942_s20 = smov (!%p36_p0, %s38_s20), %s1565_s15 }
  0x13   : > { %p1676_p3 = por %p270_p2, %p269_p1  ;;  %p275_p4 = scmp.ne.s32.totalorder %s1545_s10, %s1541_s30 }
  0x14   : > { %p40_p5 = scmp.ge.s32.totalorder %s1942_s20, 2  ;;  %p276_p6 = scmp.eq.s32.totalorder %s1252_s18, 7 }
  0x15   : > { %s1918_s21 = scalar_select %p1676_p3, 1, 0 }
  0x16   : > { %p1255_p7 = scmp.ge.s32.totalorder %s1569_s16, 1  ;;  %p405_p8 = scmp.lt.s32.totalorder %s1569_s16, 9 }
  0x17   : > { %1919 = sst [smem:[#allocation15_spill]] %s1918_s21  ;;  %s1944_s20 = smov (%p40_p5, %s1942_s20), 0 }
  0x18   : > { %1920 = sst [smem:[#allocation16_spill]] %s1944_s20  ;;  %p1686_p9 = por %p276_p6, %p275_p4 }
  0x19   : > { %p406_p10 = pnand %p1255_p7, %p405_p8  ;;  %s256_s23 = ssub.s32 %s1565_s15, %s1944_s20 }
  0x1a   : > { %s1921_s22 = scalar_select %p1686_p9, 1, 0 }
  0x1b   : > { %s259_s24 = sadd.s32 1, %s1549_s11  ;;  %p257_p11 = scmp.eq.s32.totalorder %s256_s23, 0 }
  0x1c   : > { %1922 = sst [smem:[#allocation17_spill]] %s1921_s22  ;;  %409 = sbr.rel (%p406_p10) target bundleno = 1538 (0x602), region = 52 }
  0x1d   : > { %s1694_s25 = scalar_select %p257_p11, %s1549_s11, %s259_s24  }
  0x1e   : > { %s1697_s26 = sand.u32 (!%p406_p10), 1, %s1545_s10   ;;  %s1258_s27 = sshll.u32 (!%p406_p10), %s1553_s12, 1 }
  0x1f   : > { %1923 = sst [smem:[#allocation18_spill]] %s1694_s25  ;;  %s1256_s28 = sshll.u32 (!%p406_p10), %s1697_s26, 4 }
  0x20   : > { %p497_p12 = scmp.lt.s32.totalorder (!%p406_p10), %s1557_s13, 1  ;;  %p499_p13 = scmp.lt.s32.totalorder (!%p406_p10), %s1258_s27, 7 }
  0x21   : > { %s1924_s3 = sld [smem:[#allocation19_spill]]  ;;  %s1741_s20 = scalar_lea.vmem [#allocation4], %s1256_s28 }
  0x22   : > { %s498_s29 = scalar_select %p497_p12, %s1557_s13, 1 }
  0x23   : > { %s1946_s27 = smov (!%p499_p13, %s1258_s27), 7  ;;  %p1280_p0 = scmp.ne.s32.totalorder %s1553_s12, 0 }
  0x24   : > { %s1260_s17 = sshll.u32 %s498_s29, 4  ;;  %s1259_s14 = sshll.u32 %s1946_s27, 1 }
  0x25   : > { %s538_s15 = scalar_lea.vmem %s1889_s4, %s1260_s17  ;;  %s1275_s25 = sshll.u32 %s1946_s27, 3 }
  0x26   : > { %s503_s11 = sadd.s32 %s1260_s17, %s1259_s14  ;;  %s1712_s30 = scalar_lea.vmem %s1890_s5, %s1275_s25 }
  0x27   : > { %s533_s23 = scalar_lea.vmem %s1924_s3, %s1260_s17  ;;  %s1261_s16 = sshll.u32 %s503_s11, 3 }
  0x28   : > { %s1319_s8 = sshll.u32 %s1946_s27, 5  ;;  %s1717_s21 = scalar_lea.vmem %s1885_s0, %s1261_s16 }
  0x29   : > { %s1722_s19 = scalar_lea.vmem %s1886_s1, %s1261_s16  ;;  %s1727_s14 = scalar_lea.vmem %s1887_s2, %s1261_s16 }
  0x2a   : > { %s1732_s11 = scalar_lea.vmem %s1891_s6, %s1319_s8  ;;  %s1737_s9 = scalar_lea.vmem %s1892_s7, %s1946_s27 }
  0x2b   : > { %s1739_s29 = scalar_lea.vmem [#allocation2], %s1256_s28  ;;  %560 = sbr.rel (%p1280_p0) target bundleno = 53 (0x35), region = 56 }
  0x30   : > { %v561_v0 = vld [vmem:[%s533_s23] sm:$0xff]  ;;  %vm563_vm0 = vcmask 261120   ;;  %v562_v1 = vld [vmem:[%s533_s23 + $0x8] sm:$0xff] }
  0x31   : > { %v566_v2 = vld [vmem:[%s538_s15] sm:$0xff]  ;;  %564 = vst.msk [vmem:[%s1739_s29] sm:$0xff] %vm563_vm0, %v561_v0  ;;  %v567_v3 = vld [vmem:[%s538_s15 + $0x8] sm:$0xff] }
  0x32   : > { %565 = vst.msk [vmem:[%s1739_s29 + $0x8] sm:$0xff] %vm563_vm0, %v562_v1 }
  0x33   : > { %568 = vst.msk [vmem:[%s1741_s20] sm:$0xff] %vm563_vm0, %v566_v2 }
  0x34   : > { %569 = vst.msk [vmem:[%s1741_s20 + $0x8] sm:$0xff] %vm563_vm0, %v567_v3 }
  0x35 PF: > { %v584_v4 = vld [vmem:[%s1732_s11 + $0x18] sm:$0xff]  ;;  %v583_v5 = vld [vmem:[%s1732_s11 + $0x10] sm:$0xff]  ;;  %vm616_vm1 = vcmask 64512   ;;  %v582_v6 = vld [vmem:[%s1732_s11 + $0x8] sm:$0xff]  ;;  %v1571_v8 = vmov 0   ;;  %vm586_vm2 = vcmask 261120  }
  0x36   : > { %605 = vmatpush.msra.mxu0 %v584_v4  ;;  %v580_v7 = vld [vmem:[%s1712_s30] sm:$0xff]  ;;  %1407 = vset.pattern.permute.xlu0 %v1571_v8  ;;  %v575_v10 = vld [vmem:[%s1717_s21 + $0x8] sm:$0xff]  ;;  %s1572_s3 = smov 32   ;;  %vm658_vm3 = vcmask 130048   ;;  %s1573_s8 = smov 64  }
  0x37   : > { %638 = vmatpush.msra.mxu1 %v580_v7  ;;  %v574_v9 = vld [vmem:[%s1717_s21] sm:$0xff]  ;;  %1322 = vmatpush.msra.mxu3 %v580_v7  ;;  %v579_v11 = vld [vmem:[%s1727_s14 + $0x8] sm:$0xff]  ;;  %s1320_s15 = sshll.u32 %s1557_s13, 4  ;;  %s1926_s27 = sld [smem:[#allocation21_spill]] }
  0x38   : > { %606 = vmatpush.msra.mxu0 %v583_v5  ;;  %1283 = vmatmul.msk.f32.vlgmr.msra.gmra.mxu1 %vm616_vm1, %v574_v9  ;;  %v581_v12 = vld [vmem:[%s1732_s11] sm:$0xff]  ;;  %v577_v29 = vld [vmem:[%s1722_s19 + $0x8] sm:$0xff]  ;;  %s1034_s23 = sshll.u32 %s1741_s20, 4  ;;  %s1035_s23 = int_to_ptr.vmem [resolvable:$true] %s1034_s23 }
  0x39   : > { %1284 = vmatmul.msk.f32.vlgmr.msra.gmra.mxu3 %vm616_vm1, %v575_v10  ;;  %653 = vperm.xlu0 %1407, %v579_v11   ;;  %v570_v13 = vld [vmem:[%s1739_s29] sm:$0xff]  ;;  %v571_v15 = vld [vmem:[%s1739_s29 + $0x8] sm:$0xff] }
  0x3a   : > { %607 = vmatpush.msra.mxu0 %v582_v6  ;;  %1408 = vset.pattern.permute.xlu1 %v1571_v8  ;;  %v578_v14 = vld [vmem:[%s1727_s14] sm:$0xff] }
  0x3b   : > { %v573_v16 = vld [vmem:[%s1741_s20 + $0x8] sm:$0xff]  ;;  %v572_v17 = vld [vmem:[%s1741_s20] sm:$0xff] }
  0x3c   : > { %608 = vmatpush.msra.mxu0 %v581_v12  ;;  %737 = vrot.lane.b32.xlu2 %v572_v17, %s1572_s3  ;;  %v576_v28 = vld [vmem:[%s1722_s19] sm:$0xff] }
  0x3d   : > { %1281 = vmatmul.msk.f32.vlgmr.msra.gmra.mxu0 %vm586_vm2, %v570_v13  ;;  %v1409_v30 = vld [vmem:[%s1737_s9] ss:$0 sm:$0xff]  ;;  %s1033_s28 = scalar_lea.hbm %s1926_s27, %s1320_s15 }
  0x3e   : > { %s1036_s18 = sshll.u32 %s1033_s28, 4  ;;  %s1037_s18 = int_to_ptr.hbm [resolvable:$true] %s1036_s18 }
  0x3f   : > { %s1457_s24 = sshra.s32 %s1037_s18, 4  ;;  %s1458_s24 = int_to_ptr.hbm [resolvable:$true] %s1457_s24 }
  0x40   : > { %p1464_p5 = scmp.lt.s32.totalorder %s1458_s24, %s1926_s27 }
  0x41   : > { %648 = vperm.xlu0 %1407, %v578_v14  }
  0x45   : > { %1282 = vmatmul.msk.f32.gmra.mxu0 %vm586_vm2, %v571_v15  ;;  %v1294_v15 = vld [vmem:[%s1727_s14 + $0x18] sm:$0xff] }
  0x49   : > { %739 = vrot.lane.b32.xlu0 %v573_v16, %s1572_s3 }
  0x96   : > { %v738_v5 = vpop.permute.xlu2 %737 }
  0xab   : > { %v654_v18 = vpop.permute.xlu0 %653 }
  0xb3   : > { %v649_v25 = vpop.permute.xlu0 %648 }
  0xb5   : > { %v640_v20 = vpop.f32.mrf.mxu1 }
  0xba   : > { %v610_v19 = vpop.f32.mrf.mxu0 }
  0xbb   : > { %v641_v23 = vadd.f32 %v640_v20, %v610_v19  ;;  %v740_v10 = vpop.permute.xlu0 %739  ;;  %v1298_v19 = vld [vmem:[%s1732_s11 + $0x30] sm:$0xff]  ;;  %v1297_v20 = vld [vmem:[%s1732_s11 + $0x28] sm:$0xff] }
  0xbc   : > { %v643_v21 = vpop.f32.mrf.mxu3 }
  0xbd   : > { %v656_v27 = vmul.f32 %v649_v25, %v641_v23 }
  0xc2   : > { %v613_v22 = vpop.f32.mrf.mxu0 }
  0xc3   : > { %v644_v24 = vadd.f32 %v643_v21, %v613_v22  ;;  %v1296_v21 = vld [vmem:[%s1732_s11 + $0x20] sm:$0xff] }
  0xc5   : > { %v657_v26 = vmul.f32 %v654_v18, %v644_v24  ;;  %v1295_v24 = vld [vmem:[%s1712_s30 + $0x8] sm:$0xff]  ;;  %s1574_s30 = smov 96  }
  0xc6   : > { %849 = vmatpush.msrb.mxu1 %v1295_v24 }
  0xc7   : > { %679 = vmatpush.msrb.mxu0 %v657_v26  ;;  %1323 = vmatpush.msra.mxu2 %v657_v26  ;;  %v1293_v26 = vld [vmem:[%s1727_s14 + $0x10] sm:$0xff]  ;;  %s1459_s14 = scalar_lea.hbm %s1458_s24, 16 }
  0xc8   : > { %p1460_p1 = scmp.ne.s32.totalorder %s1458_s24, %s1459_s14 }
  0xc9   : > { %680 = vmatpush.msrb.mxu0 %v656_v27  ;;  %1324 = vmatpush.msra.mxu2 %v656_v27 }
  0xca   : > { %1285 = vmatmul.msk.f32.vlgmr.msrb.gmra.mxu0 %vm658_vm3, %v576_v28  ;;  %1286 = vmatmul.msk.f32.vlgmr.msra.gmra.mxu2 %vm658_vm3, %v577_v29  ;;  %v1290_v28 = vld [vmem:[%s1717_s21 + $0x18] sm:$0xff]  ;;  %p1461_p2 = pnand %p1460_p1, %p1676_p3 }
  0xcc   : > { %p1462_p4 = pneg %p1461_p2 }
 0x147   : > { %v682_v31 = vpop.f32.mrf.mxu0 }
 0x148   : > { %v688_v32 = vmul.f32 %v682_v31, %v649_v25  ;;  %v1289_v25 = vld [vmem:[%s1717_s21 + $0x10] sm:$0xff] }
 0x149   : > { %1303 = vmatmul.msk.f32.vlgmr.msrb.gmra.mxu1 %vm616_vm1, %v1289_v25 }
 0x14a   : > { %v693_v33 = vadd.f32 %v1409_v30, %v688_v32 }
 0x14c   : > { %1411 = vtanh.f32 %v693_v33  ;;  %v1287_v39 = vmul.f32 -1.442695, %v693_v33 }
 0x14d   : > { %v685_v34 = vpop.f32.mrf.mxu2 }
 0x14e   : > { %v689_v35 = vmul.f32 %v685_v34, %v654_v18  ;;  %v1299_v18 = vld [vmem:[%s1732_s11 + $0x38] sm:$0xff]  ;;  %s1463_s11 = scalar_lea.hbm %s1926_s27, 32 }
 0x14f   : > { %817 = vmatpush.msrb.mxu3 %v1299_v18  ;;  %p1465_p6 = scmp.lt.s32.totalorder %s1463_s11, %s1459_s14 }
 0x150   : > { %v694_v36 = vadd.f32 %v1409_v30, %v689_v35 }
 0x151   : > { %818 = vmatpush.msrb.mxu3 %v1298_v19  ;;  %1304 = vmatmul.msk.f32.gmra.mxu1 %vm616_vm1, %v1290_v28  ;;  %p1466_p7 = por %p1465_p6, %p1464_p5 }
 0x152   : > { %v1412_v37 = vpop.eup %1411  ;;  %1413 = vtanh.f32 %v694_v36  ;;  %v1288_v40 = vmul.f32 -1.442695, %v694_v36 }
 0x153   : > { %747 = vrot.lane.b32.xlu1 %v1412_v37, %s1573_s8  ;;  %1415 = vpow2.f32 %v1287_v39  ;;  %819 = vmatpush.msrb.mxu3 %v1297_v20  ;;  %p1467_p8 = pnand %p1466_p7, %p1462_p4 }
 0x154   : > { %1417 = vpow2.f32 %v1288_v40  ;;  %v1291_v40 = vld [vmem:[%s1722_s19 + $0x10] sm:$0xff] }
 0x155   : > { %820 = vmatpush.msrb.mxu3 %v1296_v21 }
 0x158   : > { %v1414_v38 = vpop.eup %1413 }
 0x159   : > { %v1416_v41 = vpop.eup %1415 }
 0x15a   : > { %v701_v42 = vadd.f32 1.0, %v1416_v41  ;;  %v1418_v43 = vpop.eup %1417  ;;  %v1292_v41 = vld [vmem:[%s1722_s19 + $0x18] sm:$0xff]  ;;  %s1005_s19 = scalar_lea.sflag [#allocation5], %s1697_s26 }
 0x15b   : > { %749 = vrot.lane.b32.xlu1 %v1414_v38, %s1573_s8  ;;  %v702_v44 = vadd.f32 1.0, %v1418_v43 }
 0x15c   : > { %1419 = vrcp.f32 %v701_v42  ;;  %v714_v53 = vand.u32 2147483648, %v701_v42  ;;  %vm708_vm5 = vweird.f32 %v701_v42  ;;  %v712_v54 = vand.u32 2147483647, %v701_v42 }
 0x15d   : > { %1421 = vrcp.f32 %v702_v44  ;;  %v729_v62 = vand.u32 2147483648, %v702_v44  ;;  %vm723_vm9 = vweird.f32 %v702_v44  ;;  %v727_v63 = vand.u32 2147483647, %v702_v44 }
 0x15e   : > { %v715_v57 = vor.u32 1.1754944e-38, %v714_v53  ;;  %vm713_vm7 = vcmp.eq.f32.partialorder %v712_v54, 8.507059e+37 }
 0x15f   : > { %v730_v1 = vor.u32 1.1754944e-38, %v729_v62  ;;  %vm728_vm11 = vcmp.eq.f32.partialorder %v727_v63, 8.507059e+37 }
 0x162   : > { %v1420_v45 = vpop.eup %1419 }
 0x163   : > { %v704_v46 = vmul.f32 %v1420_v45, %v701_v42  ;;  %v1422_v48 = vpop.eup %1421  ;;  %vm709_vm4 = vweird.f32 %v1420_v45  ;;  %v1410_v42 = vld [vmem:[%s1737_s9 + $0x1] ss:$0 sm:$0xff] }
 0x164   : > { %v719_v50 = vmul.f32 %v1422_v48, %v702_v44  ;;  %vm710_vm6 = vmor %vm708_vm5, %vm709_vm4  ;;  %vm724_vm8 = vweird.f32 %v1422_v48 }
 0x165   : > { %v705_v47 = vsub.f32 1.0, %v704_v46  ;;  %vm725_vm10 = vmor %vm723_vm9, %vm724_vm8 }
 0x166   : > { %v720_v52 = vsub.f32 1.0, %v719_v50 }
 0x167   : > { %v706_v49 = vmul.f32 %v1420_v45, %v705_v47 }
 0x168   : > { %v721_v56 = vmul.f32 %v1422_v48, %v720_v52 }
 0x169   : > { %v707_v51 = vadd.f32 %v1420_v45, %v706_v49 }
 0x16a   : > { %v722_v60 = vadd.f32 %v1422_v48, %v721_v56 }
 0x16b   : > { %v711_v55 = vsel %vm710_vm6, %v1420_v45, %v707_v51 }
 0x16c   : > { %v716_v58 = vsel %vm713_vm7, %v715_v57, %v711_v55  ;;  %v726_v0 = vsel %vm725_vm10, %v1422_v48, %v722_v60 }
 0x16d   : > { %v731_v2 = vsel %vm728_vm11, %v730_v1, %v726_v0  ;;  %v743_v6 = vmul.f32 %v738_v5, %v716_v58 }
 0x16e   : > { %v744_v11 = vmul.f32 %v740_v10, %v731_v2 }
 0x1c5   : > { %v748_v59 = vpop.permute.xlu1 %747 }
 0x1c6   : > { %v753_v61 = vmul.f32 %v748_v59, %v716_v58  ;;  %v851_v30 = vpop.f32.mrf.mxu1 }
 0x1c8   : > { %757 = vrot.lane.b32.xlu2 %v753_v61, %s1572_s3 }
 0x1cd   : > { %v750_v3 = vpop.permute.xlu1 %749 }
 0x1ce   : > { %v754_v4 = vmul.f32 %v750_v3, %v731_v2  ;;  %v854_v32 = vpop.f32.mrf.mxu1 }
 0x1d0   : > { %759 = vrot.lane.b32.xlu1 %v754_v4, %s1572_s3 }
 0x222   : > { %v758_v7 = vpop.permute.xlu2 %757 }
 0x223   : > { %v1776_v8 = vadd.f32 %v758_v7, %v743_v6 }
 0x225   : > { %1423 = vtanh.f32 %v1776_v8 }
 0x22b   : > { %v1424_v9 = vpop.eup %1423 }
 0x22c   : > { %769 = vrot.lane.b32.xlu2 %v1424_v9, %s1573_s8 }
 0x242   : > { %v760_v12 = vpop.permute.xlu1 %759 }
 0x243   : > { %v1780_v13 = vadd.f32 %v760_v12, %v744_v11 }
 0x245   : > { %1425 = vtanh.f32 %v1780_v13 }
 0x24b   : > { %v1426_v14 = vpop.eup %1425 }
 0x24c   : > { %771 = vrot.lane.b32.xlu0 %v1426_v14, %s1573_s8 }
 0x254   : > { %864 = vperm.xlu0 %1407, %v1294_v15  }
 0x286   : > { %v770_v16 = vpop.permute.xlu2 %769 }
 0x287   : > { %v775_v17 = vmul.f32 %v770_v16, %v716_v58 }
 0x289   : > { %797 = vrot.lane.b32.xlu1 %v775_v17, %s1572_s3 }
 0x291   : > { %859 = vperm.xlu1 %1408, %v1293_v26  }
 0x2be   : > { %v772_v22 = vpop.permute.xlu0 %771 }
 0x2bf   : > { %v776_v23 = vmul.f32 %v772_v22, %v731_v2 }
 0x2c1   : > { %799 = vrot.lane.b32.xlu2 %v776_v23, %s1572_s3 }
 0x2c6   : > { %v865_v36 = vpop.permute.xlu0 %864 }
 0x2fb   : > { %v798_v27 = vpop.permute.xlu1 %797 }
 0x2fc   : > { %1301 = vmatmul.msk.f32.vlgmr.msrb.gmra.mxu3 %vm586_vm2, %v798_v27 }
 0x303   : > { %v860_v37 = vpop.permute.xlu1 %859 }
 0x31b   : > { %v800_v29 = vpop.permute.xlu2 %799 }
 0x31c   : > { %1302 = vmatmul.msk.f32.gmra.mxu3 %vm586_vm2, %v800_v29 }
 0x37f   : > { %v822_v31 = vpop.f32.mrf.mxu3 }
 0x380   : > { %v852_v34 = vadd.f32 %v851_v30, %v822_v31 }
 0x382   : > { %v867_v39 = vmul.f32 %v860_v37, %v852_v34 }
 0x39f   : > { %v825_v33 = vpop.f32.mrf.mxu3 }
 0x3a0   : > { %v855_v35 = vadd.f32 %v854_v32, %v825_v33 }
 0x3a2   : > { %v868_v38 = vmul.f32 %v865_v36, %v855_v35 }
 0x3a4   : > { %889 = vmatpush.msrb.mxu2 %v868_v38 }
 0x3a6   : > { %890 = vmatpush.msrb.mxu2 %v867_v39 }
 0x3a7   : > { %1305 = vmatmul.msk.f32.vlgmr.msrb.gmra.mxu2 %vm658_vm3, %v1291_v40 }
 0x3af   : > { %1306 = vmatmul.msk.f32.gmra.mxu2 %vm658_vm3, %v1292_v41 }
 0x42a   : > { %v892_v43 = vpop.f32.mrf.mxu2 }
 0x42b   : > { %v898_v44 = vmul.f32 %v892_v43, %v860_v37 }
 0x42d   : > { %v903_v45 = vadd.f32 %v1410_v42, %v898_v44 }
 0x42f   : > { %1427 = vtanh.f32 %v903_v45  ;;  %v1307_v51 = vmul.f32 -1.442695, %v903_v45 }
 0x432   : > { %v895_v46 = vpop.f32.mrf.mxu2 }
 0x433   : > { %v899_v47 = vmul.f32 %v895_v46, %v865_v36 }
 0x435   : > { %v1428_v48 = vpop.eup %1427  ;;  %v904_v49 = vadd.f32 %v1410_v42, %v899_v47 }
 0x436   : > { %949 = vrot.lane.b32.xlu2 %v1428_v48, %s1573_s8 }
 0x437   : > { %1429 = vtanh.f32 %v904_v49  ;;  %v1308_v57 = vmul.f32 -1.442695, %v904_v49 }
 0x438   : > { %1431 = vpow2.f32 %v1307_v51 }
 0x43d   : > { %v1430_v50 = vpop.eup %1429 }
 0x43e   : > { %951 = vrot.lane.b32.xlu0 %v1430_v50, %s1573_s8  ;;  %v1432_v52 = vpop.eup %1431 }
 0x43f   : > { %v911_v53 = vadd.f32 1.0, %v1432_v52 }
 0x441   : > { %1433 = vrcp.f32 %v911_v53  ;;  %v924_v60 = vand.u32 2147483648, %v911_v53  ;;  %vm918_vm13 = vweird.f32 %v911_v53  ;;  %v922_v61 = vand.u32 2147483647, %v911_v53 }
 0x442   : > { %1435 = vpow2.f32 %v1308_v57 }
 0x443   : > { %v925_v0 = vor.u32 1.1754944e-38, %v924_v60  ;;  %vm923_vm15 = vcmp.eq.f32.partialorder %v922_v61, 8.507059e+37 }
 0x447   : > { %v1434_v54 = vpop.eup %1433 }
 0x448   : > { %v914_v55 = vmul.f32 %v1434_v54, %v911_v53  ;;  %vm919_vm12 = vweird.f32 %v1434_v54  ;;  %v1436_v62 = vpop.eup %1435 }
 0x449   : > { %vm920_vm14 = vmor %vm918_vm13, %vm919_vm12  ;;  %v912_v1 = vadd.f32 1.0, %v1436_v62 }
 0x44a   : > { %v915_v56 = vsub.f32 1.0, %v914_v55 }
 0x44b   : > { %1437 = vrcp.f32 %v912_v1  ;;  %v939_v11 = vand.u32 2147483648, %v912_v1  ;;  %vm933_vm1 = vweird.f32 %v912_v1  ;;  %v937_v12 = vand.u32 2147483647, %v912_v1 }
 0x44c   : > { %v916_v58 = vmul.f32 %v1434_v54, %v915_v56 }
 0x44d   : > { %v940_v15 = vor.u32 1.1754944e-38, %v939_v11  ;;  %vm938_vm4 = vcmp.eq.f32.partialorder %v937_v12, 8.507059e+37 }
 0x44e   : > { %v917_v59 = vadd.f32 %v1434_v54, %v916_v58 }
 0x450   : > { %v921_v63 = vsel %vm920_vm14, %v1434_v54, %v917_v59 }
 0x451   : > { %v926_v3 = vsel %vm923_vm15, %v925_v0, %v921_v63  ;;  %v1438_v5 = vpop.eup %1437 }
 0x452   : > { %v929_v6 = vmul.f32 %v1438_v5, %v912_v1  ;;  %vm934_vm0 = vweird.f32 %v1438_v5  ;;  %v945_v19 = vmul.f32 %v926_v3, %v1776_v8 }
 0x453   : > { %vm935_vm3 = vmor %vm933_vm1, %vm934_vm0 }
 0x454   : > { %v930_v7 = vsub.f32 1.0, %v929_v6 }
 0x456   : > { %v931_v9 = vmul.f32 %v1438_v5, %v930_v7 }
 0x458   : > { %v932_v10 = vadd.f32 %v1438_v5, %v931_v9 }
 0x45a   : > { %v936_v14 = vsel %vm935_vm3, %v1438_v5, %v932_v10 }
 0x45b   : > { %v941_v17 = vsel %vm938_vm4, %v940_v15, %v936_v14 }
 0x45c   : > { %v946_v22 = vmul.f32 %v941_v17, %v1780_v13 }
 0x490   : > { %v950_v2 = vpop.permute.xlu2 %949 }
 0x491   : > { %v955_v4 = vmul.f32 %v950_v2, %v926_v3 }
 0x493   : > { %959 = vrot.lane.b32.xlu1 %v955_v4, %s1572_s3 }
 0x4b0   : > { %v952_v16 = vpop.permute.xlu0 %951 }
 0x4b1   : > { %v956_v18 = vmul.f32 %v952_v16, %v941_v17 }
 0x4b3   : > { %961 = vrot.lane.b32.xlu2 %v956_v18, %s1572_s3 }
 0x505   : > { %v960_v20 = vpop.permute.xlu1 %959 }
 0x506   : > { %v965_v21 = vadd.f32 %v960_v20, %v945_v19 }
 0x508   : > { %1439 = vtanh.f32 %v965_v21 }
 0x50d   : > { %v962_v23 = vpop.permute.xlu2 %961 }
 0x50e   : > { %v1440_v24 = vpop.eup %1439  ;;  %v966_v25 = vadd.f32 %v962_v23, %v946_v22 }
 0x50f   : > { %971 = vrot.lane.b32.xlu0 %v1440_v24, %s1573_s8 }
 0x510   : > { %1441 = vtanh.f32 %v966_v25 }
 0x516   : > { %v1442_v26 = vpop.eup %1441 }
 0x517   : > { %973 = vrot.lane.b32.xlu1 %v1442_v26, %s1573_s8 }
 0x51f   : > { %991 = vrot.lane.b32.xlu1 %v965_v21, %s1574_s30 }
 0x581   : > { %v972_v8 = vpop.permute.xlu0 %971 }
 0x582   : > { %v977_v27 = vmul.f32 %v972_v8, %v926_v3 }
 0x584   : > { %981 = vrot.lane.b32.xlu2 %v977_v27, %s1572_s3 }
 0x589   : > { %v974_v13 = vpop.permute.xlu1 %973 }
 0x58a   : > { %v978_v28 = vmul.f32 %v974_v13, %v941_v17 }
 0x58c   : > { %993 = vrot.lane.b32.xlu2 %v966_v25, %s1574_s30  ;;  %983 = vrot.lane.b32.xlu0 %v978_v28, %s1572_s3 }
 0x591   : > { %v992_v29 = vpop.permute.xlu1 %991 }
 0x592   : > { %997 = vst.msk [vmem:[%s1741_s20] sm:$0xff] %vm586_vm2, %v992_v29 }
 0x5de   : > { %v982_v30 = vpop.permute.xlu2 %981 }
 0x5df   : > { %987 = vst.msk [vmem:[%s1739_s29] sm:$0xff] %vm586_vm2, %v982_v30 }
 0x5e6   : > { %v994_v31 = vpop.permute.xlu2 %993 }
 0x5e7   : > { %998 = vst.msk [vmem:[%s1741_s20 + $0x8] sm:$0xff] %vm586_vm2, %v994_v31 }
 0x5e8   : > { %1470 = shalt.err (!%p1467_p8)
}
 0x5e9   : > { %s1575_s9 = smov 128   ;;  %s1576_s20 = smov 8  }
 0x5ea   : > { %1326 = dma.vmem_to_hbm [thread:$0]  (%p1676_p3), %s1035_s23, 256, %s1037_s18, %s1005_s19, %s1575_s9, %s1575_s9, %s1576_s20  }
 0x5eb   : > { %s1927_s30 = sld [smem:[#allocation20_spill]]  ;;  %s1017_s28 = sshll.u32 %s1739_s29, 4  ;;  %s1018_s28 = int_to_ptr.vmem [resolvable:$true] %s1017_s28 }
 0x5ec   : > { %s1000_s14 = scalar_lea.sflag [#allocation3], %s1697_s26 }
 0x5f1   : > { %s1928_s21 = smov %s1927_s30  ;;  %s1016_s16 = scalar_lea.hbm %s1927_s30, %s1320_s15 }
 0x5f2   : > { %s1019_s24 = sshll.u32 %s1016_s16, 4  ;;  %s1491_s18 = scalar_lea.hbm %s1928_s21, 32  ;;  %s1020_s24 = int_to_ptr.hbm [resolvable:$true] %s1019_s24 }
 0x5f3   : > { %s1485_s10 = sshra.s32 %s1020_s24, 4  ;;  %s1486_s10 = int_to_ptr.hbm [resolvable:$true] %s1485_s10 }
 0x5f4   : > { %s1487_s22 = scalar_lea.hbm %s1486_s10, 16  ;;  %p1492_p13 = scmp.lt.s32.totalorder %s1486_s10, %s1928_s21 }
 0x5f5   : > { %p1488_p10 = scmp.ne.s32.totalorder %s1486_s10, %s1487_s22  ;;  %p1493_p0 = scmp.lt.s32.totalorder %s1491_s18, %s1487_s22 }
 0x5f7   : > { %p1489_p11 = pnand %p1488_p10, %p1676_p3  ;;  %p1494_p1 = por %p1493_p0, %p1492_p13 }
 0x5f9   : > { %p1490_p12 = pneg %p1489_p11 }
 0x5fb   : > { %p1495_p2 = pnand %p1494_p1, %p1490_p12 }
 0x5fe   : > { %v984_v32 = vpop.permute.xlu0 %983 }
 0x5ff   : > { %988 = vst.msk [vmem:[%s1739_s29 + $0x8] sm:$0xff] %vm586_vm2, %v984_v32 }
 0x600   : > { %1498 = shalt.err (!%p1495_p2)
}
 0x601   : > { %1325 = dma.vmem_to_hbm [thread:$0]  (%p1676_p3), %s1018_s28, 256, %s1020_s24, %s1000_s14, %s1575_s9, %s1575_s9, %s1576_s20  }
 0x602 PF: > { %s1929_s26 = sld [smem:[#allocation13_spill]] }
 0x603   : > { %s1930_s29 = sld [smem:[#allocation8_spill]] }
 0x608   : > { %p1336_p4 = scmp.ge.s32.totalorder %s1929_s26, 2 }
 0x609   : > { %s1051_s25 = sand.u32 1, %s1930_s29  }
 0x60a   : > { %p1330_p5 = pnand %p1336_p4, %p1686_p9  ;;  %s1052_s17 = scalar_lea.sflag [#allocation3], %s1051_s25 }
 0x60c   : > { %p1331_p6 = pneg %p1330_p5 }
 0x60e   : > { %1532 = dma.done.wait (%p1331_p6), %s1052_s17, 256  }
 0x60f   : > { %1534 = vsyncadd (%p1331_p6), %s1052_s17, 4294967040  ;;  %s1062_s3 = scalar_lea.sflag [#allocation5], %s1051_s25 }
 0x610   : > { %1536 = dma.done.wait (%p1331_p6), %s1062_s3, 256  }
 0x611   : > { %1538 = vsyncadd (%p1331_p6), %s1062_s3, 4294967040  ;;  %s26_s16 = sadd.s32 1, %s1929_s26   ;;  %s1932_s30 = sld [smem:[#allocation9_spill]] }
 0x612   : > { %p23_p7 = scmp.ge.s32.totalorder %s26_s16, 10   ;;  %s1933_s10 = sld [smem:[#allocation10_spill]] }
 0x613   : > { %s1934_s11 = sld [smem:[#allocation18_spill]] }
 0x614   : > { %s1935_s12 = sld [smem:[#allocation11_spill]]  ;;  %25 = sbr.rel (!%p23_p7) target bundleno = 11 (0xb), region = 135 }
 0x615   : > { %s1936_s13 = sld [smem:[#allocation12_spill]] }
 0x616   : > { %s1937_s14 = sld [smem:[#allocation14_spill]] }
 0x617   : > { %s1938_s15 = sld [smem:[#allocation16_spill]] }
 0x619   :  { %1068 = vsyncpa [#allocation3], 1 }
 0x61a   :  { %1070 = vsyncpa [#allocation3 + $0x1], 1 }
 0x61b   :  { %1071 = vsyncpa [#allocation5], 1 }
 0x61c   :  { %1073 = vsyncpa [#allocation5 + $0x1], 1 }

</bundles_post_ra>
